<compile_context>
chip_gen: v5e
topology: v5e:2x2
jax: 0.10.0
libtpu: 0.0.40
codegen_flags: <defaults>
</compile_context>

<pallas_src>
import jax
import jax.numpy as jnp
from jax.experimental import pallas as pl
from jax.experimental.pallas import tpu as pltpu


def _round_up(x, m):
    return ((x + m - 1) // m) * m


def _slot_classifier_kernel(x_ref, w_ref, b_ref, o_ref):
    # x_ref: [TM, H], w_ref: [H, L], b_ref: [1, L] (f32), o_ref: [TM, L]
    # Dropout(p=0.0) == identity, so it is a no-op here.
    acc = jnp.dot(x_ref[...], w_ref[...], preferred_element_type=jnp.float32)
    o_ref[...] = (acc + b_ref[...]).astype(o_ref.dtype)


def prepare_slot_classifier_params(weight, bias):
    """One-time prep (hoisted out of the forward): transpose W from the
    PyTorch [L, H] layout to [H, L] and pre-cast the bias to f32 [1, L].
    No lane padding of L: the kernel emits the natural L-wide output."""
    L, H = weight.shape
    w_t = weight.T                                   # [H, L]
    b2d = bias.astype(jnp.float32).reshape(1, L)     # f32 bias, added pre-cast
    return w_t, b2d


def slot_classifier_forward(x, w_t, b2d, *, block_m=None):
    """x: [B, S, H]; w_t: [H, L] (pre-transposed); b2d: [1, L] f32.
    Returns logits [B, S, L] in x.dtype."""
    B, S, H = x.shape
    L = w_t.shape[1]
    M = B * S
    dtype = x.dtype
    x_item = jnp.dtype(dtype).itemsize
    w_item = jnp.dtype(w_t.dtype).itemsize

    # Row-tile size: multiple of 16 (covers f32 (8,128) and bf16 (16,128)
    # sublane packing). Default big enough to amortize per-grid-step overhead.
    sub = 16
    if block_m is None:
        block_m = 2048 if x_item >= 4 else 4096
    tm = min(block_m, _round_up(M, sub))
    # Keep >= 2 grid steps when there is real work, so the "parallel" M axis
    # can shard across v7x's two TensorCores (harmless on v5e/v6e).
    if M >= 512:
        tm = min(tm, _round_up(pl.cdiv(M, 2), sub))

    grid = (pl.cdiv(M, tm),)
    x2d = x.reshape(M, H)   # contiguous reshape, no copy

    # Advisory cost for XLA scheduling around this mem-bound custom call.
    cost = pl.CostEstimate(
        flops=2 * M * H * L,
        transcendentals=0,
        bytes_accessed=(M * H * x_item + H * L * w_item + L * 4
                        + M * L * x_item),
    )

    # Tight scoped-VMEM budget derived from the actual per-step footprint
    # (double-buffered x/out tiles + resident W/b), padded to VMEM tiling.
    Hl, Ll = _round_up(H, 128), _round_up(L, 128)
    Hs, tms = _round_up(H, 8), _round_up(tm, 8)
    per_step_bytes = (2 * tms * Hl * x_item      # x tile, double-buffered
                      + 2 * Hs * Ll * w_item     # resident weight
                      + 2 * 8 * Ll * 4           # resident bias (f32)
                      + 2 * tms * Ll * x_item)   # out tile, double-buffered
    vmem_limit = int(min(max(2 * per_step_bytes + (4 << 20), 8 << 20),
                         40 << 20))

    out2d = pl.pallas_call(
        _slot_classifier_kernel,
        out_shape=jax.ShapeDtypeStruct((M, L), dtype),
        grid_spec=pltpu.PrefetchScalarGridSpec(
            num_scalar_prefetch=0,
            grid=grid,
            in_specs=[
                pl.BlockSpec((tm, H), lambda i: (i, 0)),   # streamed activations
                pl.BlockSpec((H, L), lambda i: (0, 0)),    # resident weight
                pl.BlockSpec((1, L), lambda i: (0, 0)),    # resident bias (f32)
            ],
            out_specs=pl.BlockSpec((tm, L), lambda i: (i, 0)),
        ),
        compiler_params=pltpu.CompilerParams(
            dimension_semantics=("parallel",),
            vmem_limit_bytes=vmem_limit,
        ),
        cost_estimate=cost,
    )(x2d, w_t, b2d)

    return out2d.reshape(B, S, L)


if __name__ == "__main__":
    # Small shapes consistent with the module's forward.
    batch, seq, hidden = 2, 8, 32
    num_slot_labels = 16

    key = jax.random.PRNGKey(0)
    kx, kw, kb = jax.random.split(key, 3)

    x = jax.random.normal(kx, (batch, seq, hidden), dtype=jnp.float32)
    # nn.Linear-shaped parameters: weight [L, H], bias [L].
    weight = jax.random.normal(kw, (num_slot_labels, hidden),
                               dtype=jnp.float32) * 0.02
    bias = jax.random.normal(kb, (num_slot_labels,), dtype=jnp.float32) * 0.02

    # One-time parameter prep (hoisted weight transpose + f32 bias cast).
    w_t, b2d = prepare_slot_classifier_params(weight, bias)

    out = slot_classifier_forward(x, w_t, b2d)
    out = jax.block_until_ready(out)

    # Sanity-check against plain JAX reference.
    ref = x @ weight.T + bias
    assert out.shape == (batch, seq, num_slot_labels)
    assert jnp.allclose(out, ref, atol=1e-5, rtol=1e-5)

    print("KERNEL_OK")
</pallas_src>

<mosaic_0001>
module attributes {stable_mosaic.version = 11 : i64} {
  func.func @_slot_classifier_kernel(%arg0: i32, %arg1: memref<16x32xf32, #tpu.memory_space<vmem>>, %arg2: memref<32x16xf32, #tpu.memory_space<vmem>>, %arg3: memref<1x16xf32, #tpu.memory_space<vmem>>, %arg4: memref<16x16xf32, #tpu.memory_space<vmem>>) attributes {dimension_semantics = [#tpu.dimension_semantics<parallel>], iteration_bounds = array<i64: 1>, scalar_prefetch = 0 : i64, scratch_operands = 0 : i64, tpu.core_type = #tpu.core_type<tc>, window_params = [{transform_indices = @transform_0, window_bounds = array<i64: 16, 32>}, {pipeline_mode = #tpu.pipeline_mode<synchronous>, transform_indices = @transform_1, window_bounds = array<i64: 32, 16>}, {pipeline_mode = #tpu.pipeline_mode<synchronous>, transform_indices = @transform_2, window_bounds = array<i64: 1, 16>}, {transform_indices = @transform_3, window_bounds = array<i64: 16, 16>}]} {
    %c0 = arith.constant 0 : index
    %c0_0 = arith.constant 0 : index
    %0 = vector.load %arg1[%c0, %c0_0] : memref<16x32xf32, #tpu.memory_space<vmem>>, vector<16x32xf32>
    %c0_1 = arith.constant 0 : index
    %c0_2 = arith.constant 0 : index
    %1 = vector.load %arg2[%c0_1, %c0_2] : memref<32x16xf32, #tpu.memory_space<vmem>>, vector<32x16xf32>
    %cst = arith.constant dense<0.000000e+00> : vector<16x16xf32>
    %2 = tpu.matmul %0, %1, %cst {dimension_numbers = #tpu.dot_dimension_numbers<[1], [0], [0], [1], [0, 0, 1, 1], [], []>} : vector<16x32xf32>, vector<32x16xf32>, vector<16x16xf32> -> vector<16x16xf32>
    %c0_3 = arith.constant 0 : index
    %c0_4 = arith.constant 0 : index
    %3 = vector.load %arg3[%c0_3, %c0_4] : memref<1x16xf32, #tpu.memory_space<vmem>>, vector<1x16xf32>
    %4 = vector.broadcast %3 : vector<1x16xf32> to vector<16x16xf32>
    %5 = arith.addf %2, %4 : vector<16x16xf32>
    %c0_5 = arith.constant 0 : index
    %c0_6 = arith.constant 0 : index
    %6 = vector.load %arg4[%c0_5, %c0_6] : memref<16x16xf32, #tpu.memory_space<vmem>>, vector<16x16xf32>
    tpu.vector_store %arg4[%c0_5, %c0_6], %5 {strides = array<i32>} : memref<16x16xf32, #tpu.memory_space<vmem>>, vector<16x16xf32>,
    return
  }
  func.func @transform_0(%arg0: i32) -> (i32, i32) {
    %c0_i32 = arith.constant 0 : i32
    %c0_i32_0 = arith.constant 0 : i32
    return %arg0, %c0_i32 : i32, i32
  }
  func.func @transform_1(%arg0: i32) -> (i32, i32) {
    %c0_i32 = arith.constant 0 : i32
    %c0_i32_0 = arith.constant 0 : i32
    %c0_i32_1 = arith.constant 0 : i32
    return %c0_i32, %c0_i32_0 : i32, i32
  }
  func.func @transform_2(%arg0: i32) -> (i32, i32) {
    %c0_i32 = arith.constant 0 : i32
    %c0_i32_0 = arith.constant 0 : i32
    %c0_i32_1 = arith.constant 0 : i32
    return %c0_i32, %c0_i32_0 : i32, i32
  }
  func.func @transform_3(%arg0: i32) -> (i32, i32) {
    %c0_i32 = arith.constant 0 : i32
    %c0_i32_0 = arith.constant 0 : i32
    return %arg0, %c0_i32 : i32, i32
  }
}

</mosaic_0001>

<bundles_post_ra>
// kernel: tpu_custom_call.1
= control target key start
LH: loop header
LB: loop body
LE: loop exit
PB: predicated region body
PF: predicated region fallthrough
CT: control target
= control target key end

     0   :  { %s159_s0 = inlined_call_operand.vmem [shape: f32[16,32], index: 0, kind: input, shape index: {}]   ;;  %s160_s1 = inlined_call_operand.vmem [shape: f32[32,16], index: 1, kind: input, shape index: {}]   ;;  %s161_s2 = inlined_call_operand.vmem [shape: f32[1,16], index: 2, kind: input, shape index: {}]   ;;  %s162_s3 = inlined_call_operand.hbm [shape: f32[16,16], index: 3, kind: output, shape index: {}]  }
   0x1   :  { %v20_v0 = vld [vmem:[%s160_s1 + $0x18] sm:$0xff]  ;;  %v19_v1 = vld [vmem:[%s160_s1 + $0x10] sm:$0xff]  ;;  %v18_v2 = vld [vmem:[%s160_s1 + $0x8] sm:$0xff] }
   0x2   :  { %44 = vmatpush.msra.mxu0 %v20_v0  ;;  %78 = vmatpush.msra.mxu1 %v20_v0 }
   0x3   :  { %8 = vsyncpa [#allocation3], 0  ;;  %v17_v3 = vld [vmem:[%s160_s1] sm:$0xff]  ;;  %vm25_vm0 = vcmask 261120   ;;  %v16_v5 = vld [vmem:[%s159_s0 + $0x8] sm:$0xff]  ;;  %s112_s1 = smov [#allocation2]  }
   0x4   :  { %45 = vmatpush.msra.mxu0 %v19_v1  ;;  %79 = vmatpush.msra.mxu1 %v19_v1  ;;  %v15_v4 = vld [vmem:[%s159_s0] sm:$0xff]  ;;  %s62_s26 = sshll.u32 %s112_s1, 4  ;;  %s64_s29 = sshll.u32 %s162_s3, 4  ;;  %vm55_vm1 = vcmask 130048   ;;  %s63_s26 = int_to_ptr.vmem [resolvable:$true] %s62_s26  ;;  %s65_s29 = int_to_ptr.hbm [resolvable:$true] %s64_s29 }
   0x5   :  { %v85_v6 = vld [vmem:[%s161_s2] ss:$0 sm:$0xff]  ;;  %s113_s0 = smov 128   ;;  %s114_s30 = smov 8  }
   0x6   :  { %46 = vmatpush.msra.mxu0 %v18_v2  ;;  %80 = vmatpush.msra.mxu1 %v18_v2 }
   0x8   :  { %47 = vmatpush.msra.mxu0 %v17_v3  ;;  %81 = vmatpush.msra.mxu1 %v17_v3 }
   0x9   :  { %76 = vmatmul.msk.f32.vlgmr.msra.gmra.mxu0 %vm25_vm0, %v15_v4  ;;  %77 = vmatmul.msk.f32.vlgmr.msra.gmra.mxu1 %vm25_vm0, %v16_v5 }
  0x86   :  { %v49_v7 = vpop.f32.mrf.mxu0  ;;  %v52_v8 = vpop.f32.mrf.mxu1 }
  0x87   :  { %v50_v9 = vadd.f32 %v85_v6, %v49_v7  ;;  %v53_v10 = vadd.f32 %v85_v6, %v52_v8 }
  0x89   :  { %56 = vst.msk [vmem:[#allocation2] sm:$0xff] %vm55_vm1, %v50_v9 }
  0x8a   :  { %57 = vst.msk [vmem:[#allocation2 + $0x8] sm:$0xff] %vm55_vm1, %v53_v10 }
  0x8b   :  { %70 = dma.vmem_to_hbm [thread:$0]  %s63_s26, 256, %s65_s29, [#allocation3], %s113_s0, %s113_s0, %s114_s30  }
  0x8c   :  { %110 = dma.done.wait [#allocation3], 256  }
  0x8d   :  { %111 = vsyncadd [#allocation3], 4294967040 }
  0x8e   :  { %75 = vsyncpa [#allocation3], 1 }

</bundles_post_ra>
